<compile_context>
chip_gen: v7x
topology: tpu7x:2x2x1
jax: 0.10.0
libtpu: 0.0.40
codegen_flags: <defaults>
</compile_context>

<pallas_src>
import jax
import jax.numpy as jnp
from jax.experimental import pallas as pl
from jax.experimental.pallas import tpu as pltpu

_LN_EPS = 1e-5  # torch.nn.LayerNorm default


def _round_up(x, m):
    return ((x + m - 1) // m) * m


def _ln_linear_kernel(x_ref, w_ref, o_ref, xhat_ref):
    # x_ref:    (tm, K)   input rows (resident across the j-sweep)
    # w_ref:    (K, tn)   weight column tile
    # o_ref:    (tm, tn)  output tile
    # xhat_ref: (tm, K)   normalized rows cached in the weight dtype (VMEM scratch)

    # LayerNorm only on the first column tile of each row tile; cached for j > 0.
    @pl.when(pl.program_id(1) == 0)
    def _():
        x = x_ref[...].astype(jnp.float32)
        mean = jnp.mean(x, axis=-1, keepdims=True)
        centered = x - mean
        # Two-pass variance (matches torch.nn.LayerNorm; avoids E[x^2]-mean^2
        # cancellation).  Normalize + downcast in a single fused expression.
        var = jnp.mean(centered * centered, axis=-1, keepdims=True)
        xhat_ref[...] = (centered * jax.lax.rsqrt(var + _LN_EPS)).astype(
            xhat_ref.dtype
        )

    # MXU operands stay in the weight's native dtype (bf16 path for bf16 weights),
    # accumulate in f32.
    o_ref[...] = jnp.dot(
        xhat_ref[...], w_ref[...], preferred_element_type=jnp.float32
    ).astype(o_ref.dtype)


def _vmem_cap_bytes():
    """Physical VMEM per TensorCore minus headroom (v7x: 64 MiB, v5e/v6e: 128 MiB)."""
    try:
        phys = pltpu.get_tpu_info().vmem_capacity_bytes
    except Exception:
        phys = 64 * 1024 * 1024  # conservative fallback (v7x-sized)
    return max(phys - 8 * 1024 * 1024, 32 * 1024 * 1024)


def _footprint_bytes(tm, tn, k, x_b, w_b, o_b):
    xhat = tm * k * w_b           # x_hat scratch (single buffer)
    ln_tmp = 2 * tm * k * 4       # f32 temporaries inside the LN pass
    x_io = 2 * tm * k * x_b       # double-buffered input tile
    w_io = 2 * k * tn * w_b       # double-buffered weight tile
    o_io = 2 * tm * tn * o_b      # double-buffered output tile
    return xhat + ln_tmp + x_io + w_io + o_io


def _select_tiles(m, k, n_pad128, x_b, w_b, o_b, cap):
    """Pick (tm, tn).  Prefer big row tiles and a fully VMEM-resident weight
    (weight read from HBM once); otherwise stream lane-dense (K, tn) tiles."""
    budget = int(cap * 0.7)  # leave headroom for compiler temps / spills
    m_pad8 = _round_up(m, 8)
    for tm in (512, 384, 256, 128, 64, 32, 16, 8):
        tm_eff = min(tm, m_pad8)
        # Option A: whole weight resident -> single j tile.
        if _footprint_bytes(tm_eff, n_pad128, k, x_b, w_b, o_b) <= budget:
            return tm_eff, n_pad128
        # Option B: stream the weight as (K, tn) column tiles.
        fitting = [
            min(t, n_pad128)
            for t in (512, 256, 128)
            if _footprint_bytes(tm_eff, min(t, n_pad128), k, x_b, w_b, o_b) <= budget
        ]
        if fitting:
            for t in fitting:  # prefer a tile that divides N (no wasted pad columns)
                if n_pad128 % t == 0:
                    return tm_eff, t
            return tm_eff, fitting[0]
    return min(8, m_pad8), min(128, n_pad128)


def ln_linear(x, w_t, *, tm=None, tn=None, vmem_limit_bytes=None):
    """Fused LayerNorm(no affine) + Linear(no bias).

    x:   (..., fc_dim1)
    w_t: (fc_dim1, fc_dim2)  -- the torch Linear weight transposed.
    """
    orig_shape = x.shape
    k = orig_shape[-1]
    n = w_t.shape[1]
    assert w_t.shape[0] == k

    x2d = x.reshape(-1, k)
    m = x2d.shape[0]

    x_b = jnp.dtype(x.dtype).itemsize
    w_b = jnp.dtype(w_t.dtype).itemsize
    o_b = jnp.dtype(x.dtype).itemsize

    cap = _vmem_cap_bytes()
    n_pad128 = _round_up(n, 128)

    if tm is None or tn is None:
        tm_sel, tn_sel = _select_tiles(m, k, n_pad128, x_b, w_b, o_b, cap)
        tm = tm if tm is not None else tm_sel
        tn = tn if tn is not None else tn_sel
    assert tn % 128 == 0, "tn must be a multiple of 128 lanes"

    # --- Row (M) tiling: clamp tile to problem size, pad M to the tile. ---
    tm_eff = min(tm, _round_up(m, 8))
    m_pad = _round_up(m, tm_eff)
    if m_pad != m:
        x2d = jnp.pad(x2d, ((0, m_pad - m), (0, 0)))

    # --- Column (N) tiling: lane-dense, pad N to the tile. ---
    # NOTE: this pad is a full K*N copy; for best perf pre-pad the weight once at
    # parameter-setup time and pass the already-padded array here (pad is skipped).
    tn_eff = min(tn, n_pad128)
    n_pad = _round_up(n, tn_eff)
    if n_pad != n:
        w_t = jnp.pad(w_t, ((0, 0), (0, n_pad - n)))

    grid = (m_pad // tm_eff, n_pad // tn_eff)

    # --- VMEM budget: tiles + x_hat scratch + LN f32 temporaries, clamped to chip. ---
    if vmem_limit_bytes is None:
        needed = _footprint_bytes(tm_eff, tn_eff, k, x_b, w_b, o_b)
        vmem_limit_bytes = min(
            max(int(needed * 1.15) + (2 << 20), 32 * 1024 * 1024), cap
        )

    cost = pl.CostEstimate(
        flops=2 * m_pad * k * n_pad + 8 * m_pad * k,
        transcendentals=m_pad,
        bytes_accessed=m_pad * k * x_b + k * n_pad * w_b + m_pad * n_pad * o_b,
    )

    out = pl.pallas_call(
        _ln_linear_kernel,
        out_shape=jax.ShapeDtypeStruct((m_pad, n_pad), x.dtype),
        grid_spec=pltpu.PrefetchScalarGridSpec(
            num_scalar_prefetch=0,
            grid=grid,
            in_specs=[
                pl.BlockSpec((tm_eff, k), lambda i, j: (i, 0)),
                pl.BlockSpec((k, tn_eff), lambda i, j: (0, j)),
            ],
            out_specs=pl.BlockSpec((tm_eff, tn_eff), lambda i, j: (i, j)),
            scratch_shapes=[pltpu.VMEM((tm_eff, k), w_t.dtype)],
        ),
        compiler_params=pltpu.CompilerParams(
            # j must be "arbitrary": one core owns the full j-sweep of a row tile so
            # the cached x_hat scratch stays valid; i-tiles shard across cores.
            dimension_semantics=("parallel", "arbitrary"),
            vmem_limit_bytes=vmem_limit_bytes,
        ),
        cost_estimate=cost,
    )(x2d, w_t)

    out = out[:m, :n]
    return out.reshape(*orig_shape[:-1], n)


def ln_linear_reference(x, w_t):
    x = x.astype(jnp.float32)
    w_t = w_t.astype(jnp.float32)
    mean = jnp.mean(x, axis=-1, keepdims=True)
    var = jnp.mean((x - mean) ** 2, axis=-1, keepdims=True)
    x_hat = (x - mean) / jnp.sqrt(var + _LN_EPS)
    return x_hat @ w_t


if __name__ == "__main__":
    key = jax.random.PRNGKey(0)

    # --- Test 1: small f32 shapes consistent with the module. ---
    batch, seq, fc_dim1, fc_dim2 = 2, 8, 32, 64
    kx, kw, kx2, kw2 = jax.random.split(key, 4)

    x = jax.random.normal(kx, (batch, seq, fc_dim1), dtype=jnp.float32)
    # torch Linear weight layout is [fc_dim2, fc_dim1]; kernel takes it transposed.
    w_torch_layout = jax.random.normal(kw, (fc_dim2, fc_dim1), dtype=jnp.float32) * (
        1.0 / jnp.sqrt(fc_dim1)
    )
    w_t = w_torch_layout.T  # (fc_dim1, fc_dim2)

    out = ln_linear(x, w_t)
    jax.block_until_ready(out)
    ref = ln_linear_reference(x, w_t)
    assert out.shape == (batch, seq, fc_dim2)
    assert jnp.allclose(out, ref, atol=1e-4, rtol=1e-4)

    # --- Test 2: bf16, non-tile-aligned rows (exercises padding + bf16 MXU path
    #             + x_hat scratch reuse). ---
    m2, k2, n2 = 300, 256, 512
    x2 = jax.random.normal(kx2, (m2, k2), dtype=jnp.bfloat16)
    w2 = (
        jax.random.normal(kw2, (k2, n2), dtype=jnp.float32) * (1.0 / jnp.sqrt(k2))
    ).astype(jnp.bfloat16)

    out2 = ln_linear(x2, w2)
    jax.block_until_ready(out2)
    ref2 = ln_linear_reference(x2, w2)
    assert out2.shape == (m2, n2)
    # bf16 MXU operands (f32 accumulation) -> looser tolerance vs f32 reference.
    assert jnp.allclose(out2.astype(jnp.float32), ref2, atol=5e-2, rtol=5e-2)

    print("KERNEL_OK")
</pallas_src>

<mosaic_0001>
module attributes {stable_mosaic.version = 11 : i64} {
  func.func @_ln_linear_kernel(%arg0: i32, %arg1: i32, %arg2: memref<16x32xf32, #tpu.memory_space<vmem>>, %arg3: memref<32x128xf32, #tpu.memory_space<vmem>>, %arg4: memref<16x128xf32, #tpu.memory_space<vmem>>, %arg5: memref<16x32xf32, #tpu.memory_space<vmem>>) attributes {dimension_semantics = [#tpu.dimension_semantics<parallel>, #tpu.dimension_semantics<arbitrary>], iteration_bounds = array<i64: 1, 1>, scalar_prefetch = 0 : i64, scratch_operands = 1 : i64, tpu.core_type = #tpu.core_type<tc>, window_params = [{transform_indices = @transform_0, window_bounds = array<i64: 16, 32>}, {transform_indices = @transform_1, window_bounds = array<i64: 32, 128>}, {transform_indices = @transform_2, window_bounds = array<i64: 16, 128>}]} {
    %c0_i32 = arith.constant 0 : i32
    %0 = arith.cmpi eq, %arg1, %c0_i32 : i32
    %1 = arith.extui %0 : i1 to i32
    %c0_i32_0 = arith.constant 0 : i32
    %2 = arith.cmpi ne, %1, %c0_i32_0 : i32
    scf.if %2 {
      %c0_6 = arith.constant 0 : index
      %c0_7 = arith.constant 0 : index
      %7 = vector.load %arg2[%c0_6, %c0_7] : memref<16x32xf32, #tpu.memory_space<vmem>>, vector<16x32xf32>
      %cst_8 = arith.constant dense<0.000000e+00> : vector<16xf32>
      %8 = vector.multi_reduction <add>, %7, %cst_8 [1] : vector<16x32xf32> to vector<16xf32>
      %9 = vector.shape_cast %8 : vector<16xf32> to vector<16x1xf32>
      %cst_9 = arith.constant 3.200000e+01 : f32
      %10 = vector.broadcast %cst_9 : f32 to vector<16x1xf32>
      %11 = arith.divf %9, %10 : vector<16x1xf32>
      %12 = vector.broadcast %11 : vector<16x1xf32> to vector<16x32xf32>
      %13 = arith.subf %7, %12 : vector<16x32xf32>
      %14 = arith.mulf %13, %13 : vector<16x32xf32>
      %cst_10 = arith.constant dense<0.000000e+00> : vector<16xf32>
      %15 = vector.multi_reduction <add>, %14, %cst_10 [1] : vector<16x32xf32> to vector<16xf32>
      %16 = vector.shape_cast %15 : vector<16xf32> to vector<16x1xf32>
      %cst_11 = arith.constant 3.200000e+01 : f32
      %17 = vector.broadcast %cst_11 : f32 to vector<16x1xf32>
      %18 = arith.divf %16, %17 : vector<16x1xf32>
      %cst_12 = arith.constant 9.99999974E-6 : f32
      %19 = vector.broadcast %cst_12 : f32 to vector<16x1xf32>
      %20 = arith.addf %18, %19 : vector<16x1xf32>
      %21 = math.rsqrt %20 : vector<16x1xf32>
      %22 = vector.broadcast %21 : vector<16x1xf32> to vector<16x32xf32>
      %23 = arith.mulf %13, %22 : vector<16x32xf32>
      %c0_13 = arith.constant 0 : index
      %c0_14 = arith.constant 0 : index
      %24 = vector.load %arg5[%c0_13, %c0_14] : memref<16x32xf32, #tpu.memory_space<vmem>>, vector<16x32xf32>
      tpu.vector_store %arg5[%c0_13, %c0_14], %23 {strides = array<i32>} : memref<16x32xf32, #tpu.memory_space<vmem>>, vector<16x32xf32>,
    } else {
    }
    %c0 = arith.constant 0 : index
    %c0_1 = arith.constant 0 : index
    %3 = vector.load %arg5[%c0, %c0_1] : memref<16x32xf32, #tpu.memory_space<vmem>>, vector<16x32xf32>
    %c0_2 = arith.constant 0 : index
    %c0_3 = arith.constant 0 : index
    %4 = vector.load %arg3[%c0_2, %c0_3] : memref<32x128xf32, #tpu.memory_space<vmem>>, vector<32x128xf32>
    %cst = arith.constant dense<0.000000e+00> : vector<16x128xf32>
    %5 = tpu.matmul %3, %4, %cst {dimension_numbers = #tpu.dot_dimension_numbers<[1], [0], [0], [1], [0, 0, 1, 1], [], []>} : vector<16x32xf32>, vector<32x128xf32>, vector<16x128xf32> -> vector<16x128xf32>
    %c0_4 = arith.constant 0 : index
    %c0_5 = arith.constant 0 : index
    %6 = vector.load %arg4[%c0_4, %c0_5] : memref<16x128xf32, #tpu.memory_space<vmem>>, vector<16x128xf32>
    tpu.vector_store %arg4[%c0_4, %c0_5], %5 {strides = array<i32>} : memref<16x128xf32, #tpu.memory_space<vmem>>, vector<16x128xf32>,
    return
  }
  func.func @transform_0(%arg0: i32, %arg1: i32) -> (i32, i32) {
    %c0_i32 = arith.constant 0 : i32
    %c0_i32_0 = arith.constant 0 : i32
    return %arg0, %c0_i32 : i32, i32
  }
  func.func @transform_1(%arg0: i32, %arg1: i32) -> (i32, i32) {
    %c0_i32 = arith.constant 0 : i32
    %c0_i32_0 = arith.constant 0 : i32
    return %c0_i32, %arg1 : i32, i32
  }
  func.func @transform_2(%arg0: i32, %arg1: i32) -> (i32, i32) {
    %c0_i32 = arith.constant 0 : i32
    return %arg0, %arg1 : i32, i32
  }
}

</mosaic_0001>

<bundles_post_ra>
// kernel: tpu_custom_call.1
= control target key start
LH: loop header
LB: loop body
LE: loop exit
PB: predicated region body
PF: predicated region fallthrough
CT: control target
= control target key end

     0   :  { %7 = vsyncpa [#allocation4], 0  ;;  %s365_s0 = inlined_call_operand.hbm [shape: f32[16,32], index: 0, kind: input, shape index: {}]   ;;  %s366_s1 = inlined_call_operand.hbm [shape: f32[32,128], index: 1, kind: input, shape index: {}]   ;;  %s367_s2 = inlined_call_operand.hbm [shape: f32[16,128], index: 2, kind: output, shape index: {}]  }
   0x1   :  { %8 = vsyncpa [#allocation7], 0 }
   0x2   :  { %9 = vsyncpa [#allocation5], 0  ;;  %s292_s9 = smov [#allocation3]   ;;  %s220_s13 = scalar_lea.hbm %s365_s0, 256 }
   0x3   :  { %s15_s10 = sshll.u32 %s292_s9, 4  ;;  %p221_p0 = scmp.ne.s32.totalorder %s365_s0, %s220_s13  ;;  %s16_s10 = int_to_ptr.vmem [resolvable:$true] %s15_s10 }
   0x4   :  { %p224_p1 = scmp.lt.u32.totalorder %s220_s13, %s365_s0 }
   0x6   :  { %p226_p2 = pnand %p224_p1, %p221_p0 }
   0x8   :  { %229 = shalt.err (!%p226_p2)
}
   0x9   :  { %s230_s18 = scalar_lea.vmem %s16_s10, 256  ;;  %p235_p4 = scmp.lt.s32.totalorder %s16_s10, %s16_s10 }
   0xa   :  { %p231_p3 = scmp.ne.s32.totalorder %s16_s10, %s230_s18  ;;  %p236_p5 = scmp.lt.s32.totalorder %s230_s18, %s230_s18 }
   0xc   :  { %p237_p6 = por %p236_p5, %p235_p4 }
   0xe   :  { %p238_p7 = pnand %p237_p6, %p231_p3 }
  0x10   :  { %241 = shalt.err (!%p238_p7)
}
  0x11   :  { %s293_s19 = smov 128   ;;  %s294_s20 = smov 8  }
  0x12   :  { %21 = dma.hbm_to_vmem [thread:$0]  %s365_s0, 256, %s16_s10, [#allocation4], %s293_s19, %s293_s19, %s294_s20  }
  0x13   :  { %s295_s23 = smov [#allocation6]   ;;  %s242_s27 = scalar_lea.hbm %s366_s1, 512 }
  0x14   :  { %s27_s24 = sshll.u32 %s295_s23, 4  ;;  %p243_p8 = scmp.ne.s32.totalorder %s366_s1, %s242_s27  ;;  %s28_s24 = int_to_ptr.vmem [resolvable:$true] %s27_s24 }
  0x15   :  { %p246_p9 = scmp.lt.u32.totalorder %s242_s27, %s366_s1 }
  0x17   :  { %p248_p10 = pnand %p246_p9, %p243_p8 }
  0x19   :  { %251 = shalt.err (!%p248_p10)
}
  0x1a   :  { %s252_s4 = scalar_lea.vmem %s28_s24, 512  ;;  %p257_p12 = scmp.lt.s32.totalorder %s28_s24, %s28_s24 }
  0x1b   :  { %p253_p11 = scmp.ne.s32.totalorder %s28_s24, %s252_s4  ;;  %p258_p13 = scmp.lt.s32.totalorder %s252_s4, %s252_s4 }
  0x1d   :  { %p259_p0 = por %p258_p13, %p257_p12 }
  0x1f   :  { %p260_p1 = pnand %p259_p0, %p253_p11 }
  0x21   :  { %263 = shalt.err (!%p260_p1)
}
  0x22   :  { %33 = dma.hbm_to_vmem [thread:$0]  %s366_s1, 512, %s28_s24, [#allocation7], %s293_s19, %s293_s19, %s294_s20  }
  0x23   :  { %286 = dma.done.wait [#allocation4], 256  }
  0x24   :  { %287 = vsyncadd [#allocation4], 4294967040 }
  0x25   :  { %288 = dma.done.wait [#allocation7], 512  }
  0x26   :  { %289 = vsyncadd [#allocation7], 4294966784  ;;  %vm46_vm0 = vcmask 261120   ;;  %v44_v0 = vld [vmem:[#allocation3] sm:$0xff]  ;;  %v45_v1 = vld [vmem:[#allocation3 + $0x8] sm:$0xff]  ;;  %s296_s1 = smov [#allocation8]  }
  0x27   :  { %v47_v2 = vsel %vm46_vm0, %v44_v0, 0.0  ;;  %v50_v3 = vsel %vm46_vm0, %v45_v1, 0.0  ;;  %v78_v14 = vld [vmem:[#allocation6] sm:$0xff]  ;;  %v79_v15 = vld [vmem:[#allocation6 + $0x8] sm:$0xff]  ;;  %v80_v17 = vld [vmem:[#allocation6 + $0x10] sm:$0xff]  ;;  %s171_s6 = sshll.u32 %s296_s1, 4  ;;  %s172_s6 = int_to_ptr.vmem [resolvable:$true] %s171_s6 }
  0x28   :  { %48 = vadd.xlane.f32.xlu0 %v47_v2  ;;  %v203_v16 = vpack.c.bf16 %v79_v15, %v78_v14  ;;  %v81_v18 = vld [vmem:[#allocation6 + $0x18] sm:$0xff]  ;;  %s264_s7 = scalar_lea.vmem %s172_s6, 256  ;;  %p269_p3 = scmp.lt.s32.totalorder %s172_s6, %s172_s6 }
  0x29   :  { %v207_v19 = vpack.c.bf16 %v81_v18, %v80_v17  ;;  %p265_p2 = scmp.ne.s32.totalorder %s172_s6, %s264_s7  ;;  %p270_p4 = scmp.lt.s32.totalorder %s264_s7, %s264_s7 }
  0x2a   :  { %204 = vmatprep.subr.bf16.mxu0 %v203_v16 }
  0x2b   :  { %206 = vmatpush3.bf16.msra.mxu0 %v203_v16  ;;  %p271_p5 = por %p270_p4, %p269_p3 }
  0x2c   :  { %51 = vadd.xlane.f32.xlu0 %v50_v3  ;;  %208 = vmatprep.subr.bf16.mxu0 %v207_v19 }
  0x2d   :  { %p272_p6 = pnand %p271_p5, %p265_p2 }
  0x2f   :  { %210 = vmatpush3.bf16.msra.mxu0 %v207_v19 }
  0xb5   :  { %v49_v4 = vpop.xlane.xlu0 %48 }
  0xb6   :  { %v54_v5 = vmul.f32 0.03125, %v49_v4 }
  0xb8   :  { %v56_v6 = vsub.f32 %v44_v0, %v54_v5 }
  0xb9   :  { %v52_v7 = vpop.xlane.xlu0 %51 }
  0xba   :  { %v55_v8 = vmul.f32 0.03125, %v52_v7  ;;  %v58_v9 = vmul.f32 %v56_v6, %v56_v6 }
  0xbc   :  { %v57_v10 = vsub.f32 %v45_v1, %v55_v8  ;;  %v60_v11 = vsel %vm46_vm0, %v58_v9, 0.0 }
  0xbd   :  { %61 = vadd.xlane.f32.xlu1 %v60_v11 }
  0xbe   :  { %v59_v12 = vmul.f32 %v57_v10, %v57_v10 }
  0xc0   :  { %v63_v13 = vsel %vm46_vm0, %v59_v12, 0.0 }
  0xc1   :  { %64 = vadd.xlane.f32.xlu1 %v63_v13 }
 0x14a   :  { %v62_v20 = vpop.xlane.xlu1 %61 }
 0x14b   :  { %v66_v21 = vmul.f32 0.03125, %v62_v20 }
 0x14d   :  { %v68_v22 = vadd.f32 1e-05, %v66_v21 }
 0x14e   :  { %v65_v23 = vpop.xlane.xlu1 %64 }
 0x14f   :  { %216 = vrsqrt.f32 %v68_v22  ;;  %v67_v24 = vmul.f32 0.03125, %v65_v23 }
 0x151   :  { %v69_v25 = vadd.f32 1e-05, %v67_v24 }
 0x153   :  { %218 = vrsqrt.f32 %v69_v25 }
 0x159   :  { %v217_v26 = vpop.eup %216 }
 0x15a   :  { %v72_v27 = vmul.f32 %v217_v26, %v56_v6 }
 0x15c   :  { %74 = vst.msk [vmem:[#allocation2] sm:$0xff] %vm46_vm0, %v72_v27 }
 0x15d   :  { %v219_v28 = vpop.eup %218 }
 0x15e   :  { %v73_v29 = vmul.f32 %v219_v28, %v57_v10 }
 0x160   :  { %75 = vst.msk [vmem:[#allocation2 + $0x8] sm:$0xff] %vm46_vm0, %v73_v29 }
 0x163   :  { %v76_v30 = vld [vmem:[#allocation2] sm:$0xff] }
 0x164   :  { %200 = vmatprep.mubr.msk.f32.mxu0 %vm46_vm0, %v76_v30 }
 0x167   :  { %v77_v31 = vld [vmem:[#allocation2 + $0x8] sm:$0xff] }
 0x168   :  { %201 = vmatmul.mubr.msk.f32.vlgmr.msra.gmra.mrb[0].mxu0 %vm46_vm0, %v77_v31 }
 0x23b   :  { %v202_v32 = vpop.f32.mrb[0].mxu0 }
 0x23c   :  { %165 = vst [vmem:[#allocation8 + $0x8] sm:$0xff] %v202_v32  ;;  %v155_v33 = vpop.f32.mrb[1].mxu0 }
 0x23d   :  { %164 = vst [vmem:[#allocation8] sm:$0xff] %v155_v33 }
 0x23e   :  { %275 = shalt.err (!%p272_p6)
}
 0x23f   :  { %s276_s10 = scalar_lea.hbm %s367_s2, 256 }
 0x240   :  { %p277_p7 = scmp.ne.s32.totalorder %s367_s2, %s276_s10  ;;  %p280_p8 = scmp.lt.u32.totalorder %s276_s10, %s367_s2 }
 0x242   :  { %p282_p9 = pnand %p280_p8, %p277_p7 }
 0x244   :  { %285 = shalt.err (!%p282_p9)
}
 0x245   :  { %177 = dma.vmem_to_hbm [thread:$0]  %s172_s6, 256, %s367_s2, [#allocation5], %s293_s19, %s293_s19, %s294_s20  }
 0x246   :  { %290 = dma.done.wait [#allocation5], 256  }
 0x247   :  { %291 = vsyncadd [#allocation5], 4294967040 }
 0x248   :  { %181 = vsyncpa [#allocation4], 1 }
 0x249   :  { %182 = vsyncpa [#allocation7], 1 }
 0x24a   :  { %183 = vsyncpa [#allocation5], 1 }

</bundles_post_ra>
